<compile_context>
chip_gen: v5e
topology: v5e:2x2
jax: 0.10.0
libtpu: 0.0.40
codegen_flags: <defaults>
</compile_context>

<pallas_src>
import functools
import math

import jax
import jax.numpy as jnp
from jax.experimental import pallas as pl
from jax.experimental.pallas import tpu as pltpu


RELU_FLAG = False   # mirrors config.relu_flag: False -> gelu branch of the module
LN_EPS = 1e-5       # torch.nn.LayerNorm default eps


# ----------------------------------------------------------------------------
# In-kernel math helpers (VPU/EUP-only ops)
# ----------------------------------------------------------------------------
def _erf(x):
    # erf via Abramowitz & Stegun 7.1.26, |err| <= 1.5e-7.  Keeps the module's
    # exact-GELU semantics without relying on a lax.erf lowering inside Mosaic.
    a1, a2, a3, a4, a5 = 0.254829592, -0.284496736, 1.421413741, -1.453152027, 1.061405429
    p = 0.3275911
    ax = jnp.abs(x)
    t = 1.0 / (1.0 + p * ax)
    poly = ((((a5 * t + a4) * t + a3) * t + a2) * t + a1) * t
    y = 1.0 - poly * jnp.exp(-ax * ax)
    return jnp.where(x >= 0, y, -y)


def _gelu(x):
    # x * 0.5 * (1 + erf(x / sqrt(2)))  -- matches the module's gelu()
    return x * 0.5 * (1.0 + _erf(x * (1.0 / math.sqrt(2.0))))


def _layer_norm(x, gamma, beta, eps):
    mu = jnp.mean(x, axis=-1, keepdims=True)
    xc = x - mu
    var = jnp.mean(xc * xc, axis=-1, keepdims=True)
    return xc * jax.lax.rsqrt(var + eps) * gamma + beta


def _full_spec(shape):
    zeros = (0,) * len(shape)
    return pl.BlockSpec(shape, lambda b: zeros)   # grid-invariant -> stays resident


# ----------------------------------------------------------------------------
# Kernel 1: token + positional embedding
# ----------------------------------------------------------------------------
def _embed_kernel(src_ref, tok_ref, pos_ref, out_ref):
    ids = src_ref[0]                                   # (L, 1) int32
    L = ids.shape[0]
    V = tok_ref.shape[0]
    # embedding gather as a one-hot @ table matmul (MXU-friendly, no gather needed)
    onehot = (jax.lax.broadcasted_iota(jnp.int32, (L, V), 1) == ids).astype(jnp.float32)
    tok = jnp.dot(onehot, tok_ref[...], preferred_element_type=jnp.float32)
    out_ref[0] = (tok + pos_ref[...]).astype(out_ref.dtype)   # dropout == identity (eval)


def embed_apply(src, tok_table, pos_table):
    B, L = src.shape
    V, H = tok_table.shape
    src3 = src.astype(jnp.int32)[..., None]            # (B, L, 1)
    tok_scaled = tok_table * math.sqrt(H)              # fold the sqrt(hid_dim) scale (wrapper-side)
    pos_slice = pos_table[:L]                          # pos ids are exactly arange(L)
    return pl.pallas_call(
        _embed_kernel,
        out_shape=jax.ShapeDtypeStruct((B, L, H), jnp.float32),
        grid_spec=pltpu.PrefetchScalarGridSpec(
            num_scalar_prefetch=0,
            grid=(B,),
            in_specs=[
                pl.BlockSpec((1, L, 1), lambda b: (b, 0, 0)),
                _full_spec((V, H)),
                _full_spec((L, H)),
            ],
            out_specs=pl.BlockSpec((1, L, H), lambda b: (b, 0, 0)),
        ),
        compiler_params=pltpu.CompilerParams(dimension_semantics=("parallel",)),
    )(src3, tok_scaled, pos_slice)


# ----------------------------------------------------------------------------
# Kernel 2: one fused EncoderLayer (MHA + add&LN + FFN + add&LN)
# ----------------------------------------------------------------------------
def _encoder_layer_kernel(x_ref, mask_ref,
                          wqkv_ref, bqkv_ref, wo_ref, bo_ref,
                          g_ref, beta_ref, w1_ref, b1_ref, w2_ref, b2_ref,
                          out_ref, *, n_heads, use_relu, eps):
    _, L, H = x_ref.shape
    x = x_ref[0]            # (L, H)
    mask = mask_ref[0]      # (1, L)  1.0 = real key, 0.0 = padding

    # ---- fused Q/K/V projection: all heads in ONE batched contraction -------
    # Weights arrive pre-transposed, head-major (3*nh, H, d) with 1/sqrt(d)
    # already folded into the Q slab -> no in-kernel .T, no per-head slices,
    # no extra scale pass, and the output is directly head-major.
    G = 3 * n_heads
    xb = jnp.broadcast_to(x, (G, L, H))
    qkv = jnp.einsum("glc,gcd->gld", xb, wqkv_ref[...],
                     preferred_element_type=jnp.float32) + bqkv_ref[...]
    q = qkv[:n_heads]                 # (nh, L, d), pre-scaled
    k = qkv[n_heads:2 * n_heads]      # (nh, L, d)
    v = qkv[2 * n_heads:]             # (nh, L, d)

    # ---- scaled dot-product attention, heads batched on the leading axis ----
    energy = jnp.einsum("hqd,hkd->hqk", q, k, preferred_element_type=jnp.float32)
    energy = jnp.where(mask[None, :, :] > 0.5, energy, -1e10)   # masked_fill(mask==0, -1e10)
    m = jnp.max(energy, axis=-1, keepdims=True)
    e = jnp.exp(energy - m)
    denom = jnp.sum(e, axis=-1, keepdims=True)
    # exact reciprocal keeps the f32 unit test tight; approx=True would move it to the EUP
    attn = e * pl.reciprocal(denom, approx=False)
    # attention dropout == identity (eval); attention matrix stays on-chip (not an output)
    ctx = jnp.einsum("hqk,hkd->hqd", attn, v, preferred_element_type=jnp.float32)  # (nh, L, d)

    # ---- output projection: concat_h(ctx_h) @ Wo^T == sum_h ctx_h @ Wo_h -----
    per_head = jnp.einsum("hqd,hdf->hqf", ctx, wo_ref[...],
                          preferred_element_type=jnp.float32)   # (nh, L, H)
    # Head reduction of the already-batched MXU results: just nh-1 vreg adds
    # (statically unrolled) -- no per-head matmuls, stores, or concatenates.
    attn_out = per_head[0]
    for h in range(1, n_heads):
        attn_out = attn_out + per_head[h]
    attn_out = attn_out + bo_ref[...]                            # (L, H)

    # ---- residual + LayerNorm (the module shares ONE LayerNorm per layer) ---
    h1 = _layer_norm(x + attn_out, g_ref[...], beta_ref[...], eps)

    # ---- position-wise feed-forward ------------------------------------------
    f = jnp.dot(h1, w1_ref[...], preferred_element_type=jnp.float32) + b1_ref[...]
    f = jnp.maximum(f, 0.0) if use_relu else _gelu(f)            # dropout == identity
    f = jnp.dot(f, w2_ref[...], preferred_element_type=jnp.float32) + b2_ref[...]

    out_ref[0] = _layer_norm(h1 + f, g_ref[...], beta_ref[...], eps).astype(out_ref.dtype)


def encoder_layer_apply(x, src_mask, layer_params, *, n_heads, use_relu, eps=LN_EPS):
    B, L, H = x.shape
    assert H % n_heads == 0
    d = H // n_heads
    (wq, bq, wk, bk, wv, bv, wo, bo, g, beta, w1, b1, w2, b2) = layer_params
    F = w1.shape[0]
    scale = 1.0 / math.sqrt(d)

    # Wrapper-side weight plumbing (free at trace time, never re-done per grid step):
    #   pre-transpose, head-major layout, Q/K/V stacking, and scale folding.
    def head_major(w):                          # torch (out, in) -> (nh, in, d)
        return jnp.transpose(w.T.reshape(H, n_heads, d), (1, 0, 2))

    wqkv = jnp.concatenate(
        [head_major(wq) * scale, head_major(wk), head_major(wv)], axis=0)      # (3nh, H, d)
    bqkv = jnp.concatenate(
        [(bq * scale).reshape(n_heads, 1, d),
         bk.reshape(n_heads, 1, d),
         bv.reshape(n_heads, 1, d)], axis=0)                                    # (3nh, 1, d)
    wo_h = wo.T.reshape(n_heads, d, H)          # rows of Wo^T grouped per head: (nh, d, H)

    mask3 = src_mask.astype(jnp.float32).reshape(B, 1, L)

    kernel = functools.partial(_encoder_layer_kernel, n_heads=n_heads,
                               use_relu=use_relu, eps=eps)

    return pl.pallas_call(
        kernel,
        out_shape=jax.ShapeDtypeStruct((B, L, H), jnp.float32),
        grid_spec=pltpu.PrefetchScalarGridSpec(
            num_scalar_prefetch=0,
            grid=(B,),
            in_specs=[
                pl.BlockSpec((1, L, H), lambda b: (b, 0, 0)),     # activations
                pl.BlockSpec((1, 1, L), lambda b: (b, 0, 0)),     # key-padding mask
                _full_spec((3 * n_heads, H, d)),                  # fused, pre-transposed QKV weights
                _full_spec((3 * n_heads, 1, d)),                  # fused QKV bias (Q pre-scaled)
                _full_spec((n_heads, d, H)),                      # Wo^T, head-major rows
                _full_spec((1, H)),                               # bo
                _full_spec((1, H)), _full_spec((1, H)),           # shared LayerNorm gamma, beta
                _full_spec((H, F)), _full_spec((1, F)),           # fc_1 (pre-transposed), b1
                _full_spec((F, H)), _full_spec((1, H)),           # fc_2 (pre-transposed), b2
            ],
            out_specs=pl.BlockSpec((1, L, H), lambda b: (b, 0, 0)),
        ),
        compiler_params=pltpu.CompilerParams(
            dimension_semantics=("parallel",)),
    )(x, mask3, wqkv, bqkv, wo_h, bo.reshape(1, H),
      g.reshape(1, H), beta.reshape(1, H),
      w1.T, b1.reshape(1, F), w2.T, b2.reshape(1, H))


def encoder_forward(src, src_mask, params, *, n_heads, use_relu=RELU_FLAG):
    x = embed_apply(src, params["tok"], params["pos"])           # embedding dropout == identity
    for layer_params in params["layers"]:
        x = encoder_layer_apply(x, src_mask, layer_params,
                                n_heads=n_heads, use_relu=use_relu)
    return x


# ----------------------------------------------------------------------------
# Pure-JAX reference mirroring the PyTorch forward (eval mode)
# ----------------------------------------------------------------------------
def _reference_encoder(src, src_mask, params, *, n_heads, use_relu=RELU_FLAG, eps=LN_EPS):
    tok, pos = params["tok"], params["pos"]
    B, L = src.shape
    H = tok.shape[1]
    d = H // n_heads

    def ln(x, g, b):
        mu = x.mean(-1, keepdims=True)
        var = ((x - mu) ** 2).mean(-1, keepdims=True)
        return (x - mu) / jnp.sqrt(var + eps) * g + b

    x = tok[src] * jnp.sqrt(jnp.float32(H)) + pos[:L][None]
    mask4 = src_mask[:, None, None, :]
    for (wq, bq, wk, bk, wv, bv, wo, bo, g, beta, w1, b1, w2, b2) in params["layers"]:
        Q = (x @ wq.T + bq).reshape(B, L, n_heads, d).transpose(0, 2, 1, 3)
        K = (x @ wk.T + bk).reshape(B, L, n_heads, d).transpose(0, 2, 1, 3)
        V = (x @ wv.T + bv).reshape(B, L, n_heads, d).transpose(0, 2, 1, 3)
        energy = jnp.einsum("bhqd,bhkd->bhqk", Q, K) / jnp.sqrt(jnp.float32(d))
        energy = jnp.where(mask4 == 0, -1e10, energy)
        attn = jax.nn.softmax(energy, axis=-1)
        ctx = jnp.einsum("bhqk,bhkd->bhqd", attn, V)
        ctx = ctx.transpose(0, 2, 1, 3).reshape(B, L, H)
        x = ln(x + (ctx @ wo.T + bo), g, beta)
        f = x @ w1.T + b1
        f = jnp.maximum(f, 0.0) if use_relu else f * 0.5 * (1.0 + jax.lax.erf(f / math.sqrt(2.0)))
        x = ln(x + (f @ w2.T + b2), g, beta)
    return x


# ----------------------------------------------------------------------------
if __name__ == "__main__":
    B, L, H = 2, 8, 32
    n_heads, pf_dim, n_layers = 4, 64, 2
    vocab, max_len, pad_idx = 64, 100, 0

    root = jax.random.PRNGKey(0)
    k_tok, k_pos, k_src, k_layers = jax.random.split(root, 4)

    tok_table = 0.1 * jax.random.normal(k_tok, (vocab, H), jnp.float32)
    pos_table = 0.1 * jax.random.normal(k_pos, (max_len, H), jnp.float32)

    def linear_init(k, out_dim, in_dim):
        kw, kb = jax.random.split(k)
        s = 1.0 / math.sqrt(in_dim)
        return (jax.random.uniform(kw, (out_dim, in_dim), jnp.float32, -s, s),
                jax.random.uniform(kb, (out_dim,), jnp.float32, -s, s))

    layers = []
    for lk in jax.random.split(k_layers, n_layers):
        k = jax.random.split(lk, 8)
        wq, bq = linear_init(k[0], H, H)
        wk, bk = linear_init(k[1], H, H)
        wv, bv = linear_init(k[2], H, H)
        wo, bo = linear_init(k[3], H, H)
        g = 1.0 + 0.1 * jax.random.normal(k[4], (H,), jnp.float32)
        beta = 0.1 * jax.random.normal(k[5], (H,), jnp.float32)
        w1, b1 = linear_init(k[6], pf_dim, H)
        w2, b2 = linear_init(k[7], H, pf_dim)
        layers.append((wq, bq, wk, bk, wv, bv, wo, bo, g, beta, w1, b1, w2, b2))

    params = {"tok": tok_table, "pos": pos_table, "layers": layers}

    src = jax.random.randint(k_src, (B, L), 1, vocab)
    src = src.at[1, L - 2:].set(pad_idx)                   # pad the tail of example 1
    src_mask = (src != pad_idx).astype(jnp.float32)        # (B, L): 1 = real token

    out = encoder_forward(src, src_mask, params, n_heads=n_heads)
    out = jax.block_until_ready(out)

    ref = _reference_encoder(src, src_mask, params, n_heads=n_heads)
    assert out.shape == (B, L, H)
    assert jnp.allclose(out, ref, rtol=1e-3, atol=1e-3), float(jnp.max(jnp.abs(out - ref)))

    print("KERNEL_OK")
</pallas_src>

<mosaic_0001>
module attributes {stable_mosaic.version = 11 : i64} {
  func.func @_embed_kernel(%arg0: i32, %arg1: memref<1x8x1xi32, #tpu.memory_space<vmem>>, %arg2: memref<64x32xf32, #tpu.memory_space<vmem>>, %arg3: memref<8x32xf32, #tpu.memory_space<vmem>>, %arg4: memref<1x8x32xf32, #tpu.memory_space<vmem>>) attributes {dimension_semantics = [#tpu.dimension_semantics<parallel>], iteration_bounds = array<i64: 2>, scalar_prefetch = 0 : i64, scratch_operands = 0 : i64, tpu.core_type = #tpu.core_type<tc>, window_params = [{transform_indices = @transform_0, window_bounds = array<i64: 1, 8, 1>}, {pipeline_mode = #tpu.pipeline_mode<synchronous>, transform_indices = @transform_1, window_bounds = array<i64: 64, 32>}, {pipeline_mode = #tpu.pipeline_mode<synchronous>, transform_indices = @transform_2, window_bounds = array<i64: 8, 32>}, {transform_indices = @transform_3, window_bounds = array<i64: 1, 8, 32>}]} {
    %c0 = arith.constant 0 : index
    %c0_0 = arith.constant 0 : index
    %c0_1 = arith.constant 0 : index
    %0 = vector.load %arg1[%c0, %c0_0, %c0_1] : memref<1x8x1xi32, #tpu.memory_space<vmem>>, vector<1x8x1xi32>
    %1 = vector.shape_cast %0 : vector<1x8x1xi32> to vector<8x1xi32>
    %2 = tpu.iota {dimensions = array<i32: 1>} : vector<8x64xi32>
    %3 = vector.broadcast %1 : vector<8x1xi32> to vector<8x64xi32>
    %4 = arith.cmpi eq, %2, %3 : vector<8x64xi32>
    %5 = arith.extui %4 : vector<8x64xi1> to vector<8x64xi32>
    %6 = arith.sitofp %5 : vector<8x64xi32> to vector<8x64xf32>
    %c0_2 = arith.constant 0 : index
    %c0_3 = arith.constant 0 : index
    %7 = vector.load %arg2[%c0_2, %c0_3] : memref<64x32xf32, #tpu.memory_space<vmem>>, vector<64x32xf32>
    %cst = arith.constant dense<0.000000e+00> : vector<8x32xf32>
    %8 = tpu.matmul %6, %7, %cst {dimension_numbers = #tpu.dot_dimension_numbers<[1], [0], [0], [1], [0, 0, 1, 1], [], []>} : vector<8x64xf32>, vector<64x32xf32>, vector<8x32xf32> -> vector<8x32xf32>
    %c0_4 = arith.constant 0 : index
    %c0_5 = arith.constant 0 : index
    %9 = vector.load %arg3[%c0_4, %c0_5] : memref<8x32xf32, #tpu.memory_space<vmem>>, vector<8x32xf32>
    %10 = arith.addf %8, %9 : vector<8x32xf32>
    %c0_6 = arith.constant 0 : index
    %c0_7 = arith.constant 0 : index
    %c0_8 = arith.constant 0 : index
    %11 = vector.load %arg4[%c0_6, %c0_7, %c0_8] : memref<1x8x32xf32, #tpu.memory_space<vmem>>, vector<1x8x32xf32>
    %12 = vector.shape_cast %11 : vector<1x8x32xf32> to vector<8x32xf32>
    %13 = vector.shape_cast %10 : vector<8x32xf32> to vector<1x8x32xf32>
    tpu.vector_store %arg4[%c0_6, %c0_7, %c0_8], %13 {strides = array<i32>} : memref<1x8x32xf32, #tpu.memory_space<vmem>>, vector<1x8x32xf32>,
    return
  }
  func.func @transform_0(%arg0: i32) -> (i32, i32, i32) {
    %c0_i32 = arith.constant 0 : i32
    %c0_i32_0 = arith.constant 0 : i32
    %c0_i32_1 = arith.constant 0 : i32
    return %arg0, %c0_i32, %c0_i32_0 : i32, i32, i32
  }
  func.func @transform_1(%arg0: i32) -> (i32, i32) {
    %c0_i32 = arith.constant 0 : i32
    %c0_i32_0 = arith.constant 0 : i32
    %c0_i32_1 = arith.constant 0 : i32
    return %c0_i32, %c0_i32_0 : i32, i32
  }
  func.func @transform_2(%arg0: i32) -> (i32, i32) {
    %c0_i32 = arith.constant 0 : i32
    %c0_i32_0 = arith.constant 0 : i32
    %c0_i32_1 = arith.constant 0 : i32
    return %c0_i32, %c0_i32_0 : i32, i32
  }
  func.func @transform_3(%arg0: i32) -> (i32, i32, i32) {
    %c0_i32 = arith.constant 0 : i32
    %c0_i32_0 = arith.constant 0 : i32
    %c0_i32_1 = arith.constant 0 : i32
    return %arg0, %c0_i32, %c0_i32_0 : i32, i32, i32
  }
}

</mosaic_0001>

<bundles_post_ra>
// kernel: tpu_custom_call.1
= control target key start
LH: loop header
LB: loop body
LE: loop exit
PB: predicated region body
PF: predicated region fallthrough
CT: control target
= control target key end

     0   :  { %8 = vsyncpa [#allocation3], 0  ;;  %s537_s0 = inlined_call_operand.vmem [shape: s32[2,8,1], index: 0, kind: input, shape index: {}]   ;;  %s538_s1 = inlined_call_operand.vmem [shape: f32[64,32], index: 1, kind: input, shape index: {}]   ;;  %s539_s2 = inlined_call_operand.vmem [shape: f32[8,32], index: 2, kind: input, shape index: {}]   ;;  %s540_s3 = inlined_call_operand.hbm [shape: f32[2,8,32], index: 3, kind: output, shape index: {}]  }
   0x1   :  { %10 = vsyncpa [#allocation3 + $0x1], 0  ;;  %s425_s12 = smov 0   ;;  %s427_s13 = smov 0  }
   0x2   :  { %s429_s14 = smov 0   ;;  %s431_s15 = smov 0  }
   0x3 LB: > { %s446_s16 = sadd.s32 4294967295, %s401_s15   ;;  %s285_s17 = sadd.s32 4294967294, %s401_s15   ;;  %s401_s15 = sphi %s431_s15, %s546_s15   ;;  %s397_s14 = sphi %s429_s14, %s545_s14   ;;  %s393_s13 = sphi %s427_s13, %s544_s13   ;;  %s389_s12 = sphi %s425_s12, %s543_s12  }
   0x4   : > { %s450_s18 = sadd.s32 1, %s401_s15   ;;  %s91_s19 = sadd.s32 1, %s397_s14 }
   0x5   : > { %s88_s20 = ssub.s32 %s401_s15, %s450_s18  ;;  %p101_p0 = scmp.ne.s32.totalorder %s397_s14, %s393_s13 }
   0x6   : > { %p89_p1 = scmp.eq.s32.totalorder %s88_s20, 0  ;;  %p102_p2 = scmp.eq.s32.totalorder %s446_s16, 1 }
   0x7   : > { %p107_p3 = scmp.ne.s32.totalorder %s393_s13, %s389_s12  ;;  %p108_p4 = scmp.eq.s32.totalorder %s285_s17, 1 }
   0x8   : > { %s461_s21 = scalar_select %p89_p1, %s397_s14, %s91_s19  }
   0x9   : > { %p463_p5 = por %p102_p2, %p101_p0  ;;  %p467_p6 = por %p108_p4, %p107_p3 }
   0xa   : > { %p288_p7 = scmp.ge.s32.totalorder %s401_s15, 1  ;;  %p139_p8 = scmp.lt.s32.totalorder %s401_s15, 3 }
   0xc   : > { %p140_p9 = pnand %p288_p7, %p139_p8 }
   0xd   : > { %p162_p10 = scmp.lt.s32.totalorder (!%p140_p9), %s446_s16, 1  ;;  %s159_s27 = sand.u32 (!%p140_p9), 1, %s393_s13  }
   0xe   : > { %143 = sbr.rel (%p140_p9) target bundleno = 272 (0x110), region = 32  ;;  %s294_s29 = sshll.u32 (!%p140_p9), %s446_s16, 3 }
   0xf   : > { %s221_s5 = scalar_lea.hbm (!%p140_p9), %s540_s3, %s294_s29  ;;  %s211_s11 = scalar_lea.sflag (!%p140_p9), [#allocation3], %s159_s27 }
  0x10   : > { %s225_s10 = sshll.u32 (!%p140_p9), %s221_s5, 4  ;;  %s359_s24 = scalar_lea.hbm (!%p140_p9), %s540_s3, 16  ;;  %s226_s10 = int_to_ptr.hbm [resolvable:$true] %s225_s10 }
  0x13   : > { %v182_v0 = vld [vmem:[%s538_s1 + $0x38] sm:$0xff]  ;;  %v181_v1 = vld [vmem:[%s538_s1 + $0x30] sm:$0xff]  ;;  %v403_v2 = vmov 0   ;;  %s163_s28 = scalar_select %p162_p10, %s446_s16, 1  ;;  %v180_v3 = vld [vmem:[%s538_s1 + $0x28] sm:$0xff]  ;;  %v167_v10 = vlaneseq  ;;  %vm184_vm0 = vcmask 523264  }
  0x14   : > { %338 = vset.pattern.permute.xlu0 %v403_v2  ;;  %196 = vmatpush.msra.mxu0 %v182_v0  ;;  %v179_v4 = vld [vmem:[%s538_s1 + $0x20] sm:$0xff]  ;;  %v178_v6 = vld [vmem:[%s538_s1 + $0x18] sm:$0xff]  ;;  %v177_v7 = vld [vmem:[%s538_s1 + $0x10] sm:$0xff]  ;;  %v404_v13 = vmov 0.0   ;;  %vm208_vm2 = vcmask 261120   ;;  %s353_s16 = sshra.s32 %s226_s10, 4  ;;  %s354_s16 = int_to_ptr.hbm [resolvable:$true] %s353_s16 }
  0x15   : > { %s290_s4 = sshll.u32 %s163_s28, 3  ;;  %v176_v8 = vld [vmem:[%s538_s1 + $0x8] sm:$0xff]  ;;  %v175_v9 = vld [vmem:[%s538_s1] sm:$0xff]  ;;  %v168_v11 = vand.u32 127, %v167_v10  ;;  %s289_s28 = sshll.u32 %s159_s27, 3 }
  0x16   : > { %197 = vmatpush.msra.mxu0 %v181_v1  ;;  %s165_s9 = scalar_lea.vmem %s537_s0, %s290_s4  ;;  %v183_v15 = vld [vmem:[%s539_s2] sm:$0xff]  ;;  %s161_s8 = scalar_lea.vmem [#allocation2], %s289_s28 }
  0x17   : > { %v166_v5 = vld [vmem:[%s165_s9] sm:$0xff]  ;;  %s223_s9 = sshll.u32 %s161_s8, 4  ;;  %s355_s17 = scalar_lea.hbm %s354_s16, 8  ;;  %s224_s9 = int_to_ptr.vmem [resolvable:$true] %s223_s9 }
  0x18   : > { %198 = vmatpush.msra.mxu0 %v180_v3  ;;  %170 = vperm.xlu0 %338, %v166_v5   ;;  %p356_p11 = scmp.ne.s32.totalorder %s354_s16, %s355_s17  ;;  %p360_p0 = scmp.lt.s32.totalorder %s354_s16, %s540_s3 }
  0x19   : > { %p361_p1 = scmp.lt.s32.totalorder %s359_s24, %s355_s17 }
  0x1a   : > { %199 = vmatpush.msra.mxu0 %v179_v4  ;;  %p357_p12 = pnand %p356_p11, %p463_p5 }
  0x1b   : > { %p362_p2 = por %p361_p1, %p360_p0 }
  0x1c   : > { %200 = vmatpush.msra.mxu0 %v178_v6  ;;  %p358_p13 = pneg %p357_p12 }
  0x1e   : > { %201 = vmatpush.msra.mxu0 %v177_v7  ;;  %p363_p3 = pnand %p362_p2, %p358_p13 }
  0x20   : > { %202 = vmatpush.msra.mxu0 %v176_v8 }
  0x22   : > { %203 = vmatpush.msra.mxu0 %v175_v9 }
  0x8a   : > { %v171_v12 = vpop.permute.xlu0 %170 }
  0x8b   : > { %vm172_vm1 = vcmp.eq.s32.totalorder %v168_v11, %v171_v12 }
  0x8c   : > { %v291_v14 = vsel %vm172_vm1, 1.0, %v404_v13 }
  0x8d   : > { %292 = vmatmul.msk.f32.vlgmr.msra.gmra.mxu0 %vm184_vm0, %v291_v14 }
 0x10a   : > { %v205_v16 = vpop.f32.mrf.mxu0 }
 0x10b   : > { %v206_v17 = vadd.f32 %v205_v16, %v183_v15 }
 0x10d   : > { %209 = vst.msk [vmem:[%s161_s8] sm:$0xff] %vm208_vm2, %v206_v17 }
 0x10e   : > { %366 = shalt.err (!%p363_p3)
}
 0x10f   : > { %297 = dma.vmem_to_hbm [thread:$0]  (%p463_p5), %s224_s9, 128, %s226_s10, %s211_s11  }
 0x110 PF: > { %p303_p4 = scmp.ge.s32.totalorder %s401_s15, 2  ;;  %s237_s27 = sand.u32 1, %s389_s12  }
 0x111   : > { %s238_s28 = scalar_lea.sflag [#allocation3], %s237_s27 }
 0x112   : > { %p300_p7 = pnand %p303_p4, %p467_p6 }
 0x114   : > { %p301_p8 = pneg %p300_p7 }
 0x116   : > { %384 = dma.done.wait (%p301_p8), %s238_s28, 128  }
 0x117   : > { %386 = vsyncadd (%p301_p8), %s238_s28, 4294967168  ;;  %p13_p9 = scmp.ge.s32.totalorder %s450_s18, 4   ;;  %s543_s12 = smov %s393_s13 }
 0x118   : > { %s544_s13 = smov %s397_s14  ;;  %s545_s14 = smov %s461_s21 }
 0x119   : > { %s546_s15 = smov %s450_s18  ;;  %15 = sbr.rel (!%p13_p9) target bundleno = 3 (0x3), region = 67 }
 0x11e   :  { %244 = vsyncpa [#allocation3], 1 }
 0x11f   :  { %246 = vsyncpa [#allocation3 + $0x1], 1 }

</bundles_post_ra>
